<compile_context>
chip_gen: v7x
topology: tpu7x:2x2x1
jax: 0.10.0
libtpu: 0.0.40
codegen_flags: <defaults>
</compile_context>

<pallas_src>
import functools

import jax
import jax.numpy as jnp
from jax.experimental import pallas as pl
from jax.experimental.pallas import tpu as pltpu


# ----------------------------- Pallas kernel ------------------------------- #

def moco_fused_kernel(xq_ref, xk_ref,
                      wbb_q, bbb_q, w1_q, b1_q, w2_q, b2_q,
                      wbb_k, bbb_k, w1_k, b1_k, w2_k, b2_k,
                      queue_ref,
                      logits_ref, k_out_ref, *, inv_T, K):
    """Fused MoCo forward.

    xq/xk : (B, C, S) channels-first flattened videos (S = T*H*W on lanes)
    queue : (D, K)
    logits_ref : (B, LOGITS_PAD) padded lane-dense slab; caller slices [:, :1+K]
    k_out_ref  : (B, D) normalized key embeddings (for queue enqueue)
    """

    def _encode(x_ref, wbb, bbb, w1, b1, w2, b2):
        # AdaptiveAvgPool3d((1,1,1)) == mean over S.  Pool first: for the
        # pointwise-linear backbone stand-in, mean_S(xW+b) == mean_S(x)W + b,
        # so the big (S,F) feature map is never materialized.
        pooled = jnp.mean(x_ref[...], axis=-1)                          # (B, C)
        feat = jnp.dot(pooled, wbb[...],
                       preferred_element_type=jnp.float32) + bbb[...]   # (B, F)
        # Conv3d(F,F,1)+bias on a (1,1,1) map == dense layer; then ReLU.
        h = jnp.dot(feat, w1[...],
                    preferred_element_type=jnp.float32) + b1[...]       # (B, F)
        h = jnp.maximum(h, 0.0)
        # Conv3d(F,D,1)+bias
        z = jnp.dot(h, w2[...],
                    preferred_element_type=jnp.float32) + b2[...]       # (B, D)
        # F.normalize(dim=1), eps=1e-12 on the norm -> 1e-24 on the square.
        sumsq = jnp.sum(z * z, axis=-1, keepdims=True)
        return z * jax.lax.rsqrt(jnp.maximum(sumsq, 1e-24))

    q = _encode(xq_ref, wbb_q, bbb_q, w1_q, b1_q, w2_q, b2_q)           # (B, D)
    k = _encode(xk_ref, wbb_k, bbb_k, w1_k, b1_k, w2_k, b2_k)           # (B, D)
    k_out_ref[...] = k

    # Fold 1/T into q before the contractions.
    q_s = q * jnp.float32(inv_T)
    l_pos = jnp.sum(q_s * k, axis=-1, keepdims=True)                    # (B, 1)
    l_neg = jnp.dot(q_s, queue_ref[...],
                    preferred_element_type=jnp.float32)                 # (B, K)

    # Assemble the padded lane-dense slab and do ONE full-width store
    # (avoids the masked (1+K)-lane partial store of the unpadded layout).
    B = l_pos.shape[0]
    pad_cols = logits_ref.shape[-1] - (1 + K)
    pieces = [l_pos, l_neg]
    if pad_cols > 0:
        pieces.append(jnp.zeros((B, pad_cols), jnp.float32))
    logits_ref[...] = jnp.concatenate(pieces, axis=-1)


# ------------------------------ JAX wrapper -------------------------------- #

def moco_forward(x, params_q, params_k, queue, queue_ptr, *, m, T):
    """MoCo.forward.

    x: (B, 2, C, T, H, W)  two augmented views per clip.
    Returns (logits, labels, new_params_k, new_queue, new_queue_ptr).
    """
    B, _, C, Td, H, W = x.shape
    D, K = queue.shape
    S = Td * H * W

    # NCDHW -> (B, C, S): channels-first flattened, no transpose needed.
    xq = x[:, 0].reshape(B, C, S)
    xk = x[:, 1].reshape(B, C, S)
    # TODO(synk): im_k = _change_background(im_k); im_k = clip_normalize(im_k)

    # Momentum update of the key encoder (torch.no_grad in PyTorch).
    params_k = jax.tree_util.tree_map(
        lambda pk, pq: pk * m + pq * (1.0 - m), params_k, params_q)

    logits_pad = ((1 + K + 127) // 128) * 128
    vmem = pl.BlockSpec(memory_space=pltpu.MemorySpace.VMEM)

    logits_padded, k = pl.pallas_call(
        functools.partial(moco_fused_kernel, inv_T=1.0 / T, K=K),
        out_shape=(jax.ShapeDtypeStruct((B, logits_pad), jnp.float32),
                   jax.ShapeDtypeStruct((B, D), jnp.float32)),
        in_specs=[vmem] * 15,
        out_specs=(vmem, vmem),
    )(xq, xk,
      params_q["W_bb"], params_q["b_bb"], params_q["W1"], params_q["b1"],
      params_q["W2"], params_q["b2"],
      params_k["W_bb"], params_k["b_bb"], params_k["W1"], params_k["b1"],
      params_k["W2"], params_k["b2"],
      queue)

    logits = logits_padded[:, :1 + K]                       # (B, 1+K)
    labels = jnp.zeros((B,), dtype=jnp.int32)

    # _dequeue_and_enqueue
    queue_new = jax.lax.dynamic_update_slice(queue, k.T, (0, queue_ptr))
    ptr_new = (queue_ptr + B) % K

    return logits, labels, params_k, queue_new, ptr_new


# --------------------------------- driver ---------------------------------- #

def init_params(key, C, F, D):
    ks = jax.random.split(key, 6)
    return {
        "W_bb": 0.1 * jax.random.normal(ks[0], (C, F), jnp.float32),
        "b_bb": 0.1 * jax.random.normal(ks[1], (1, F), jnp.float32),
        "W1":   0.1 * jax.random.normal(ks[2], (F, F), jnp.float32),
        "b1":   0.1 * jax.random.normal(ks[3], (1, F), jnp.float32),
        "W2":   0.1 * jax.random.normal(ks[4], (F, D), jnp.float32),
        "b2":   0.1 * jax.random.normal(ks[5], (1, D), jnp.float32),
    }


if __name__ == "__main__":
    # small shapes consistent with the module's forward (lane-friendly dims)
    B, C, T_dim, H, W = 2, 4, 4, 8, 8      # video: (B, 2 views, C, T, H, W)
    feature_size = 128                     # backbone feature dim
    dim_out = 128                          # MoCo projection dim (module default)
    K = 256                                # queue size (K % B == 0, /128 aligned)
    m = 0.999
    temperature = 0.07

    root = jax.random.PRNGKey(0)
    k_x, k_q, k_queue = jax.random.split(root, 3)

    x = jax.random.normal(k_x, (B, 2, C, T_dim, H, W), jnp.float32)

    params_q = init_params(k_q, C, feature_size, dim_out)
    # PyTorch copies q params into k params at init
    params_k = jax.tree_util.tree_map(lambda p: p, params_q)

    # queue buffer: randn(D, K) normalized over dim=0
    queue = jax.random.normal(k_queue, (dim_out, K), jnp.float32)
    queue = queue * jax.lax.rsqrt(
        jnp.maximum(jnp.sum(queue * queue, axis=0, keepdims=True), 1e-24))
    queue_ptr = jnp.int32(0)

    logits, labels, params_k, queue, queue_ptr = moco_forward(
        x, params_q, params_k, queue, queue_ptr, m=m, T=temperature)

    jax.block_until_ready(logits)
    jax.block_until_ready(queue)

    assert logits.shape == (B, 1 + K)
    assert labels.shape == (B,)
    print("KERNEL_OK")
</pallas_src>

<mosaic_0001>
module attributes {stable_mosaic.version = 11 : i64} {
  func.func @moco_fused_kernel(%arg0: memref<2x4x256xf32, #tpu.memory_space<vmem>>, %arg1: memref<2x4x256xf32, #tpu.memory_space<vmem>>, %arg2: memref<4x128xf32, #tpu.memory_space<vmem>>, %arg3: memref<1x128xf32, #tpu.memory_space<vmem>>, %arg4: memref<128x128xf32, #tpu.memory_space<vmem>>, %arg5: memref<1x128xf32, #tpu.memory_space<vmem>>, %arg6: memref<128x128xf32, #tpu.memory_space<vmem>>, %arg7: memref<1x128xf32, #tpu.memory_space<vmem>>, %arg8: memref<4x128xf32, #tpu.memory_space<vmem>>, %arg9: memref<1x128xf32, #tpu.memory_space<vmem>>, %arg10: memref<128x128xf32, #tpu.memory_space<vmem>>, %arg11: memref<1x128xf32, #tpu.memory_space<vmem>>, %arg12: memref<128x128xf32, #tpu.memory_space<vmem>>, %arg13: memref<1x128xf32, #tpu.memory_space<vmem>>, %arg14: memref<128x256xf32, #tpu.memory_space<vmem>>, %arg15: memref<2x384xf32, #tpu.memory_space<vmem>>, %arg16: memref<2x128xf32, #tpu.memory_space<vmem>>) attributes {dimension_semantics = [], scalar_prefetch = 0 : i64, scratch_operands = 0 : i64, tpu.core_type = #tpu.core_type<tc>} {
    %c0 = arith.constant 0 : index
    %c0_0 = arith.constant 0 : index
    %c0_1 = arith.constant 0 : index
    %0 = vector.load %arg0[%c0, %c0_0, %c0_1] : memref<2x4x256xf32, #tpu.memory_space<vmem>>, vector<2x4x256xf32>
    %cst = arith.constant dense<0.000000e+00> : vector<2x4xf32>
    %1 = vector.multi_reduction <add>, %0, %cst [2] : vector<2x4x256xf32> to vector<2x4xf32>
    %cst_2 = arith.constant 2.560000e+02 : f32
    %2 = vector.broadcast %cst_2 : f32 to vector<2x4xf32>
    %3 = arith.divf %1, %2 : vector<2x4xf32>
    %c0_3 = arith.constant 0 : index
    %c0_4 = arith.constant 0 : index
    %4 = vector.load %arg2[%c0_3, %c0_4] : memref<4x128xf32, #tpu.memory_space<vmem>>, vector<4x128xf32>
    %cst_5 = arith.constant dense<0.000000e+00> : vector<2x128xf32>
    %5 = tpu.matmul %3, %4, %cst_5 {dimension_numbers = #tpu.dot_dimension_numbers<[1], [0], [0], [1], [0, 0, 1, 1], [], []>} : vector<2x4xf32>, vector<4x128xf32>, vector<2x128xf32> -> vector<2x128xf32>
    %c0_6 = arith.constant 0 : index
    %c0_7 = arith.constant 0 : index
    %6 = vector.load %arg3[%c0_6, %c0_7] : memref<1x128xf32, #tpu.memory_space<vmem>>, vector<1x128xf32>
    %7 = vector.broadcast %6 : vector<1x128xf32> to vector<2x128xf32>
    %8 = arith.addf %5, %7 : vector<2x128xf32>
    %c0_8 = arith.constant 0 : index
    %c0_9 = arith.constant 0 : index
    %9 = vector.load %arg4[%c0_8, %c0_9] : memref<128x128xf32, #tpu.memory_space<vmem>>, vector<128x128xf32>
    %cst_10 = arith.constant dense<0.000000e+00> : vector<2x128xf32>
    %10 = tpu.matmul %8, %9, %cst_10 {dimension_numbers = #tpu.dot_dimension_numbers<[1], [0], [0], [1], [0, 0, 1, 1], [], []>} : vector<2x128xf32>, vector<128x128xf32>, vector<2x128xf32> -> vector<2x128xf32>
    %c0_11 = arith.constant 0 : index
    %c0_12 = arith.constant 0 : index
    %11 = vector.load %arg5[%c0_11, %c0_12] : memref<1x128xf32, #tpu.memory_space<vmem>>, vector<1x128xf32>
    %12 = vector.broadcast %11 : vector<1x128xf32> to vector<2x128xf32>
    %13 = arith.addf %10, %12 : vector<2x128xf32>
    %cst_13 = arith.constant 0.000000e+00 : f32
    %14 = vector.broadcast %cst_13 : f32 to vector<2x128xf32>
    %15 = arith.maximumf %13, %14 : vector<2x128xf32>
    %c0_14 = arith.constant 0 : index
    %c0_15 = arith.constant 0 : index
    %16 = vector.load %arg6[%c0_14, %c0_15] : memref<128x128xf32, #tpu.memory_space<vmem>>, vector<128x128xf32>
    %cst_16 = arith.constant dense<0.000000e+00> : vector<2x128xf32>
    %17 = tpu.matmul %15, %16, %cst_16 {dimension_numbers = #tpu.dot_dimension_numbers<[1], [0], [0], [1], [0, 0, 1, 1], [], []>} : vector<2x128xf32>, vector<128x128xf32>, vector<2x128xf32> -> vector<2x128xf32>
    %c0_17 = arith.constant 0 : index
    %c0_18 = arith.constant 0 : index
    %18 = vector.load %arg7[%c0_17, %c0_18] : memref<1x128xf32, #tpu.memory_space<vmem>>, vector<1x128xf32>
    %19 = vector.broadcast %18 : vector<1x128xf32> to vector<2x128xf32>
    %20 = arith.addf %17, %19 : vector<2x128xf32>
    %21 = arith.mulf %20, %20 : vector<2x128xf32>
    %cst_19 = arith.constant dense<0.000000e+00> : vector<2xf32>
    %22 = vector.multi_reduction <add>, %21, %cst_19 [1] : vector<2x128xf32> to vector<2xf32>
    %23 = vector.shape_cast %22 : vector<2xf32> to vector<2x1xf32>
    %cst_20 = arith.constant 1.000000e-24 : f32
    %24 = vector.broadcast %cst_20 : f32 to vector<2x1xf32>
    %25 = arith.maximumf %23, %24 : vector<2x1xf32>
    %26 = math.rsqrt %25 : vector<2x1xf32>
    %27 = vector.broadcast %26 : vector<2x1xf32> to vector<2x128xf32>
    %28 = arith.mulf %20, %27 : vector<2x128xf32>
    %c0_21 = arith.constant 0 : index
    %c0_22 = arith.constant 0 : index
    %c0_23 = arith.constant 0 : index
    %29 = vector.load %arg1[%c0_21, %c0_22, %c0_23] : memref<2x4x256xf32, #tpu.memory_space<vmem>>, vector<2x4x256xf32>
    %cst_24 = arith.constant dense<0.000000e+00> : vector<2x4xf32>
    %30 = vector.multi_reduction <add>, %29, %cst_24 [2] : vector<2x4x256xf32> to vector<2x4xf32>
    %cst_25 = arith.constant 2.560000e+02 : f32
    %31 = vector.broadcast %cst_25 : f32 to vector<2x4xf32>
    %32 = arith.divf %30, %31 : vector<2x4xf32>
    %c0_26 = arith.constant 0 : index
    %c0_27 = arith.constant 0 : index
    %33 = vector.load %arg8[%c0_26, %c0_27] : memref<4x128xf32, #tpu.memory_space<vmem>>, vector<4x128xf32>
    %cst_28 = arith.constant dense<0.000000e+00> : vector<2x128xf32>
    %34 = tpu.matmul %32, %33, %cst_28 {dimension_numbers = #tpu.dot_dimension_numbers<[1], [0], [0], [1], [0, 0, 1, 1], [], []>} : vector<2x4xf32>, vector<4x128xf32>, vector<2x128xf32> -> vector<2x128xf32>
    %c0_29 = arith.constant 0 : index
    %c0_30 = arith.constant 0 : index
    %35 = vector.load %arg9[%c0_29, %c0_30] : memref<1x128xf32, #tpu.memory_space<vmem>>, vector<1x128xf32>
    %36 = vector.broadcast %35 : vector<1x128xf32> to vector<2x128xf32>
    %37 = arith.addf %34, %36 : vector<2x128xf32>
    %c0_31 = arith.constant 0 : index
    %c0_32 = arith.constant 0 : index
    %38 = vector.load %arg10[%c0_31, %c0_32] : memref<128x128xf32, #tpu.memory_space<vmem>>, vector<128x128xf32>
    %cst_33 = arith.constant dense<0.000000e+00> : vector<2x128xf32>
    %39 = tpu.matmul %37, %38, %cst_33 {dimension_numbers = #tpu.dot_dimension_numbers<[1], [0], [0], [1], [0, 0, 1, 1], [], []>} : vector<2x128xf32>, vector<128x128xf32>, vector<2x128xf32> -> vector<2x128xf32>
    %c0_34 = arith.constant 0 : index
    %c0_35 = arith.constant 0 : index
    %40 = vector.load %arg11[%c0_34, %c0_35] : memref<1x128xf32, #tpu.memory_space<vmem>>, vector<1x128xf32>
    %41 = vector.broadcast %40 : vector<1x128xf32> to vector<2x128xf32>
    %42 = arith.addf %39, %41 : vector<2x128xf32>
    %cst_36 = arith.constant 0.000000e+00 : f32
    %43 = vector.broadcast %cst_36 : f32 to vector<2x128xf32>
    %44 = arith.maximumf %42, %43 : vector<2x128xf32>
    %c0_37 = arith.constant 0 : index
    %c0_38 = arith.constant 0 : index
    %45 = vector.load %arg12[%c0_37, %c0_38] : memref<128x128xf32, #tpu.memory_space<vmem>>, vector<128x128xf32>
    %cst_39 = arith.constant dense<0.000000e+00> : vector<2x128xf32>
    %46 = tpu.matmul %44, %45, %cst_39 {dimension_numbers = #tpu.dot_dimension_numbers<[1], [0], [0], [1], [0, 0, 1, 1], [], []>} : vector<2x128xf32>, vector<128x128xf32>, vector<2x128xf32> -> vector<2x128xf32>
    %c0_40 = arith.constant 0 : index
    %c0_41 = arith.constant 0 : index
    %47 = vector.load %arg13[%c0_40, %c0_41] : memref<1x128xf32, #tpu.memory_space<vmem>>, vector<1x128xf32>
    %48 = vector.broadcast %47 : vector<1x128xf32> to vector<2x128xf32>
    %49 = arith.addf %46, %48 : vector<2x128xf32>
    %50 = arith.mulf %49, %49 : vector<2x128xf32>
    %cst_42 = arith.constant dense<0.000000e+00> : vector<2xf32>
    %51 = vector.multi_reduction <add>, %50, %cst_42 [1] : vector<2x128xf32> to vector<2xf32>
    %52 = vector.shape_cast %51 : vector<2xf32> to vector<2x1xf32>
    %cst_43 = arith.constant 1.000000e-24 : f32
    %53 = vector.broadcast %cst_43 : f32 to vector<2x1xf32>
    %54 = arith.maximumf %52, %53 : vector<2x1xf32>
    %55 = math.rsqrt %54 : vector<2x1xf32>
    %56 = vector.broadcast %55 : vector<2x1xf32> to vector<2x128xf32>
    %57 = arith.mulf %49, %56 : vector<2x128xf32>
    %c0_44 = arith.constant 0 : index
    %c0_45 = arith.constant 0 : index
    %58 = vector.load %arg16[%c0_44, %c0_45] : memref<2x128xf32, #tpu.memory_space<vmem>>, vector<2x128xf32>
    tpu.vector_store %arg16[%c0_44, %c0_45], %57 {strides = array<i32>} : memref<2x128xf32, #tpu.memory_space<vmem>>, vector<2x128xf32>,
    %cst_46 = arith.constant 14.2857141 : f32
    %59 = vector.broadcast %cst_46 : f32 to vector<2x128xf32>
    %60 = arith.mulf %28, %59 : vector<2x128xf32>
    %61 = arith.mulf %60, %57 : vector<2x128xf32>
    %cst_47 = arith.constant dense<0.000000e+00> : vector<2xf32>
    %62 = vector.multi_reduction <add>, %61, %cst_47 [1] : vector<2x128xf32> to vector<2xf32>
    %63 = vector.shape_cast %62 : vector<2xf32> to vector<2x1xf32>
    %c0_48 = arith.constant 0 : index
    %c0_49 = arith.constant 0 : index
    %64 = vector.load %arg14[%c0_48, %c0_49] : memref<128x256xf32, #tpu.memory_space<vmem>>, vector<128x256xf32>
    %cst_50 = arith.constant dense<0.000000e+00> : vector<2x256xf32>
    %65 = tpu.matmul %60, %64, %cst_50 {dimension_numbers = #tpu.dot_dimension_numbers<[1], [0], [0], [1], [0, 0, 1, 1], [], []>} : vector<2x128xf32>, vector<128x256xf32>, vector<2x256xf32> -> vector<2x256xf32>
    %cst_51 = arith.constant 0.000000e+00 : f32
    %66 = vector.broadcast %cst_51 : f32 to vector<2x127xf32>
    %67 = tpu.concatenate %63, %65, %66 in 1 : vector<2x1xf32>, vector<2x256xf32>, vector<2x127xf32> -> vector<2x384xf32>
    %c0_52 = arith.constant 0 : index
    %c0_53 = arith.constant 0 : index
    %68 = vector.load %arg15[%c0_52, %c0_53] : memref<2x384xf32, #tpu.memory_space<vmem>>, vector<2x384xf32>
    tpu.vector_store %arg15[%c0_52, %c0_53], %67 {strides = array<i32>} : memref<2x384xf32, #tpu.memory_space<vmem>>, vector<2x384xf32>,
    return
  }
}

</mosaic_0001>

<bundles_post_ra>
// kernel: tpu_custom_call.1
= control target key start
LH: loop header
LB: loop body
LE: loop exit
PB: predicated region body
PF: predicated region fallthrough
CT: control target
= control target key end

     0   :  { %s1889_s0 = inlined_call_operand.hbm [shape: f32[2,4,256], index: 0, kind: input, shape index: {}]   ;;  %s1890_s1 = inlined_call_operand.hbm [shape: f32[2,4,256], index: 1, kind: input, shape index: {}]   ;;  %s1891_s2 = inlined_call_operand.vmem [shape: f32[4,128], index: 2, kind: input, shape index: {}]   ;;  %s1892_s3 = inlined_call_operand.vmem [shape: f32[1,128], index: 3, kind: input, shape index: {}]   ;;  %s1893_s4 = inlined_call_operand.hbm [shape: f32[128,128], index: 4, kind: input, shape index: {}]   ;;  %s1894_s5 = inlined_call_operand.vmem [shape: f32[1,128], index: 5, kind: input, shape index: {}]   ;;  %s1895_s6 = inlined_call_operand.hbm [shape: f32[128,128], index: 6, kind: input, shape index: {}]   ;;  %s1896_s7 = inlined_call_operand.vmem [shape: f32[1,128], index: 7, kind: input, shape index: {}]   ;;  %s1897_s8 = inlined_call_operand.vmem [shape: f32[4,128], index: 8, kind: input, shape index: {}]   ;;  %s1898_s9 = inlined_call_operand.vmem [shape: f32[1,128], index: 9, kind: input, shape index: {}]   ;;  %s1899_s10 = inlined_call_operand.hbm [shape: f32[128,128], index: 10, kind: input, shape index: {}]   ;;  %s1900_s11 = inlined_call_operand.vmem [shape: f32[1,128], index: 11, kind: input, shape index: {}]   ;;  %s1901_s12 = inlined_call_operand.hbm [shape: f32[128,128], index: 12, kind: input, shape index: {}]   ;;  %s1902_s13 = inlined_call_operand.vmem [shape: f32[1,128], index: 13, kind: input, shape index: {}]   ;;  %s1903_s14 = inlined_call_operand.hbm [shape: f32[128,256], index: 14, kind: input, shape index: {}]   ;;  %s1904_s15 = inlined_call_operand.hbm [shape: f32[2,384], index: 15, kind: output, shape index: {0}]   ;;  %s1905_s16 = inlined_call_operand.hbm [shape: f32[2,128], index: 16, kind: output, shape index: {1}]  }
   0x1   :  { %1907 = sst [smem:[#allocation23_spill]] %s1889_s0 }
   0x2   :  { %22 = vsyncpa [#allocation3], 0 }
   0x3   :  { %23 = vsyncpa [#allocation6], 0 }
   0x4   :  { %24 = vsyncpa [#allocation9], 0 }
   0x5   :  { %25 = vsyncpa [#allocation12], 0 }
   0x6   :  { %26 = vsyncpa [#allocation4], 0 }
   0x7   :  { %27 = vsyncpa [#allocation16], 0  ;;  %s1541_s21 = smov [#allocation5]   ;;  %s1542_s23 = smov [#allocation8]  }
   0x8   :  { %s45_s22 = sshll.u32 %s1541_s21, 4  ;;  %s75_s24 = sshll.u32 %s1542_s23, 4  ;;  %s46_s22 = int_to_ptr.vmem [resolvable:$true] %s45_s22  ;;  %s1644_s24 = int_to_ptr.vmem [resolvable:$true] %s75_s24 }
   0x9   :  { %s1331_s27 = scalar_lea.hbm %s1890_s1, 256 }
   0xa   :  { %p1332_p0 = scmp.ne.s32.totalorder %s1890_s1, %s1331_s27  ;;  %p1335_p1 = scmp.lt.u32.totalorder %s1331_s27, %s1890_s1 }
   0xc   :  { %p1337_p2 = pnand %p1335_p1, %p1332_p0 }
   0xe   :  { %1340 = shalt.err (!%p1337_p2)
}
   0xf   :  { %s1341_s17 = scalar_lea.vmem %s46_s22, 256  ;;  %p1346_p4 = scmp.lt.s32.totalorder %s46_s22, %s46_s22 }
  0x10   :  { %p1342_p3 = scmp.ne.s32.totalorder %s46_s22, %s1341_s17  ;;  %p1347_p5 = scmp.lt.s32.totalorder %s1341_s17, %s1341_s17 }
  0x12   :  { %p1348_p6 = por %p1347_p5, %p1346_p4 }
  0x14   :  { %p1349_p7 = pnand %p1348_p6, %p1342_p3 }
  0x16   :  { %1352 = shalt.err (!%p1349_p7)
}
  0x17   :  { %s1543_s18 = smov 128   ;;  %s1544_s19 = smov 8  }
  0x18   :  { %51 = dma.hbm_to_vmem [thread:$0]  %s1890_s1, 256, %s46_s22, [#allocation6], %s1543_s18, %s1543_s18, %s1544_s19  }
  0x19   :  { %s1353_s26 = scalar_lea.hbm %s1895_s6, 2048 }
  0x1a   :  { %p1354_p8 = scmp.ne.s32.totalorder %s1895_s6, %s1353_s26  ;;  %p1357_p9 = scmp.lt.u32.totalorder %s1353_s26, %s1895_s6 }
  0x1c   :  { %p1359_p10 = pnand %p1357_p9, %p1354_p8 }
  0x1e   :  { %1362 = shalt.err (!%p1359_p10)
}
  0x1f   :  { %s1363_s0 = scalar_lea.vmem %s1644_s24, 2048  ;;  %p1368_p12 = scmp.lt.s32.totalorder %s1644_s24, %s1644_s24 }
  0x20   :  { %p1364_p11 = scmp.ne.s32.totalorder %s1644_s24, %s1363_s0  ;;  %p1369_p13 = scmp.lt.s32.totalorder %s1363_s0, %s1363_s0 }
  0x22   :  { %p1370_p0 = por %p1369_p13, %p1368_p12 }
  0x24   :  { %p1371_p1 = pnand %p1370_p0, %p1364_p11 }
  0x26   :  { %1374 = shalt.err (!%p1371_p1)
}
  0x27   :  { %81 = dma.hbm_to_vmem [thread:$0]  %s1895_s6, 2048, %s1644_s24, [#allocation9], %s1543_s18, %s1543_s18, %s1544_s19  }
  0x28   :  { %s1545_s17 = smov [#allocation11]   ;;  %s1546_s21 = smov [#allocation2]  }
  0x29   :  { %s107_s20 = sshll.u32 %s1545_s17, 4  ;;  %s33_s23 = sshll.u32 %s1546_s21, 4  ;;  %s108_s20 = int_to_ptr.vmem [resolvable:$true] %s107_s20  ;;  %s1681_s23 = int_to_ptr.vmem [resolvable:$true] %s33_s23 }
  0x2a   :  { %s1375_s27 = scalar_lea.hbm %s1901_s12, 2048 }
  0x2b   :  { %p1376_p2 = scmp.ne.s32.totalorder %s1901_s12, %s1375_s27  ;;  %p1379_p3 = scmp.lt.u32.totalorder %s1375_s27, %s1901_s12 }
  0x2d   :  { %p1381_p4 = pnand %p1379_p3, %p1376_p2 }
  0x2f   :  { %1384 = shalt.err (!%p1381_p4)
}
  0x30   :  { %s1385_s6 = scalar_lea.vmem %s108_s20, 2048  ;;  %p1390_p6 = scmp.lt.s32.totalorder %s108_s20, %s108_s20 }
  0x31   :  { %p1386_p5 = scmp.ne.s32.totalorder %s108_s20, %s1385_s6  ;;  %p1391_p7 = scmp.lt.s32.totalorder %s1385_s6, %s1385_s6 }
  0x33   :  { %p1392_p8 = por %p1391_p7, %p1390_p6 }
  0x35   :  { %p1393_p9 = pnand %p1392_p8, %p1386_p5 }
  0x37   :  { %1396 = shalt.err (!%p1393_p9)
}
  0x38   :  { %113 = dma.hbm_to_vmem [thread:$0]  %s1901_s12, 2048, %s108_s20, [#allocation12], %s1543_s18, %s1543_s18, %s1544_s19  }
  0x39   :  { %s1908_s21 = sld [smem:[#allocation23_spill]] }
  0x3f   :  { %s1397_s25 = scalar_lea.hbm %s1908_s21, 256 }
  0x40   :  { %p1398_p10 = scmp.ne.s32.totalorder %s1908_s21, %s1397_s25  ;;  %p1401_p11 = scmp.lt.u32.totalorder %s1397_s25, %s1908_s21 }
  0x42   :  { %p1403_p12 = pnand %p1401_p11, %p1398_p10 }
  0x44   :  { %1406 = shalt.err (!%p1403_p12)
}
  0x45   :  { %s1407_s30 = scalar_lea.vmem %s1681_s23, 256  ;;  %p1412_p0 = scmp.lt.s32.totalorder %s1681_s23, %s1681_s23 }
  0x46   :  { %p1408_p13 = scmp.ne.s32.totalorder %s1681_s23, %s1407_s30  ;;  %p1413_p1 = scmp.lt.s32.totalorder %s1407_s30, %s1407_s30 }
  0x48   :  { %p1414_p2 = por %p1413_p1, %p1412_p0 }
  0x4a   :  { %p1415_p3 = pnand %p1414_p2, %p1408_p13 }
  0x4c   :  { %1418 = shalt.err (!%p1415_p3)
}
  0x4d   :  { %39 = dma.hbm_to_vmem [thread:$0]  %s1908_s21, 256, %s1681_s23, [#allocation3], %s1543_s18, %s1543_s18, %s1544_s19  }
  0x4e   :  { %s1547_s0 = smov [#allocation7]   ;;  %s1548_s24 = smov [#allocation10]  }
  0x4f   :  { %s61_s6 = sshll.u32 %s1547_s0, 4  ;;  %s93_s1 = sshll.u32 %s1548_s24, 4  ;;  %s62_s6 = int_to_ptr.vmem [resolvable:$true] %s61_s6  ;;  %s1718_s1 = int_to_ptr.vmem [resolvable:$true] %s93_s1 }
  0x50   :  { %s1419_s25 = scalar_lea.hbm %s1893_s4, 2048 }
  0x51   :  { %p1420_p4 = scmp.ne.s32.totalorder %s1893_s4, %s1419_s25  ;;  %p1423_p5 = scmp.lt.u32.totalorder %s1419_s25, %s1893_s4 }
  0x53   :  { %p1425_p6 = pnand %p1423_p5, %p1420_p4 }
  0x55   :  { %1428 = shalt.err (!%p1425_p6)
}
  0x56   :  { %s1429_s23 = scalar_lea.vmem %s62_s6, 2048  ;;  %p1434_p8 = scmp.lt.s32.totalorder %s62_s6, %s62_s6 }
  0x57   :  { %p1430_p7 = scmp.ne.s32.totalorder %s62_s6, %s1429_s23  ;;  %p1435_p9 = scmp.lt.s32.totalorder %s1429_s23, %s1429_s23 }
  0x59   :  { %p1436_p10 = por %p1435_p9, %p1434_p8 }
  0x5b   :  { %p1437_p11 = pnand %p1436_p10, %p1430_p7 }
  0x5d   :  { %1440 = shalt.err (!%p1437_p11)
}
  0x5e   :  { %67 = dma.hbm_to_vmem [thread:$0]  %s1893_s4, 2048, %s62_s6, [#allocation6], %s1543_s18, %s1543_s18, %s1544_s19  }
  0x5f   :  { %s1441_s0 = scalar_lea.hbm %s1899_s10, 2048 }
  0x60   :  { %p1442_p12 = scmp.ne.s32.totalorder %s1899_s10, %s1441_s0  ;;  %p1445_p13 = scmp.lt.u32.totalorder %s1441_s0, %s1899_s10 }
  0x62   :  { %p1447_p0 = pnand %p1445_p13, %p1442_p12 }
  0x64   :  { %1450 = shalt.err (!%p1447_p0)
}
  0x65   :  { %s1451_s26 = scalar_lea.vmem %s1718_s1, 2048  ;;  %p1456_p2 = scmp.lt.s32.totalorder %s1718_s1, %s1718_s1 }
  0x66   :  { %p1452_p1 = scmp.ne.s32.totalorder %s1718_s1, %s1451_s26  ;;  %p1457_p3 = scmp.lt.s32.totalorder %s1451_s26, %s1451_s26 }
  0x68   :  { %p1458_p4 = por %p1457_p3, %p1456_p2 }
  0x6a   :  { %p1459_p5 = pnand %p1458_p4, %p1452_p1 }
  0x6c   :  { %1462 = shalt.err (!%p1459_p5)
}
  0x6d   :  { %99 = dma.hbm_to_vmem [thread:$0]  %s1899_s10, 2048, %s1718_s1, [#allocation9], %s1543_s18, %s1543_s18, %s1544_s19  }
  0x6e   :  { %s1549_s27 = smov [#allocation13]   ;;  %s1463_s21 = scalar_lea.hbm %s1903_s14, 4096 }
  0x6f   :  { %s121_s28 = sshll.u32 %s1549_s27, 4  ;;  %p1464_p6 = scmp.ne.s32.totalorder %s1903_s14, %s1463_s21  ;;  %s122_s28 = int_to_ptr.vmem [resolvable:$true] %s121_s28 }
  0x70   :  { %p1467_p7 = scmp.lt.u32.totalorder %s1463_s21, %s1903_s14 }
  0x72   :  { %p1469_p8 = pnand %p1467_p7, %p1464_p6 }
  0x74   :  { %1472 = shalt.err (!%p1469_p8)
}
  0x75   :  { %s1473_s24 = scalar_lea.vmem %s122_s28, 4096  ;;  %p1478_p10 = scmp.lt.s32.totalorder %s122_s28, %s122_s28 }
  0x76   :  { %p1474_p9 = scmp.ne.s32.totalorder %s122_s28, %s1473_s24  ;;  %p1479_p11 = scmp.lt.s32.totalorder %s1473_s24, %s1473_s24 }
  0x78   :  { %p1480_p12 = por %p1479_p11, %p1478_p10 }
  0x7a   :  { %p1481_p13 = pnand %p1480_p12, %p1474_p9 }
  0x7c   :  { %1484 = shalt.err (!%p1481_p13)
}
  0x7d   :  { %s1550_s10 = smov 256   ;;  %s1551_s18 = smov 16  }
  0x7e   :  { %127 = dma.hbm_to_vmem [thread:$0]  %s1903_s14, 4096, %s122_s28, [#allocation12], %s1550_s10, %s1550_s10, %s1551_s18  }
  0x7f   :  { %1529 = dma.done.wait [#allocation3], 256  }
  0x80   :  { %1530 = vsyncadd [#allocation3], 4294967040 }
  0x81   :  { %1531 = dma.done.wait [#allocation6], 2304  }
  0x82   :  { %1532 = vsyncadd [#allocation6], 4294964992 }
  0x83   :  { %1533 = dma.done.wait [#allocation9], 4096  }
  0x84   :  { %1534 = vsyncadd [#allocation9], 4294963200 }
  0x85   :  { %1535 = dma.done.wait [#allocation12], 6144  }
  0x86   :  { %1536 = vsyncadd [#allocation12], 4294961152  ;;  %vm157_vm0 = vcmask 1043456   ;;  %v149_v0 = vld [vmem:[#allocation2] sm:$0xff]  ;;  %v150_v1 = vld [vmem:[#allocation2 + $0x8] sm:$0xff]  ;;  %v1552_v11 = vmov 0.0   ;;  %v181_v23 = vlaneseq }
  0x87   :  { %v153_v2 = vcombine.high %v149_v0, %v149_v0  ;;  %v158_v3 = vsel %vm157_vm0, %v149_v0, 0.0  ;;  %v154_v4 = vcombine.high %v150_v1, %v150_v1  ;;  %v163_v6 = vsel %vm157_vm0, %v150_v1, 0.0  ;;  %v171_v10 = vld [vmem:[%s1891_s2] sm:$0xf]  ;;  %1027 = vmatprep.subr.mxu1 %v1552_v11  ;;  %v464_v12 = vld [vmem:[#allocation5] sm:$0xff]  ;;  %v465_v13 = vld [vmem:[#allocation5 + $0x8] sm:$0xff] }
  0x88   :  { %vm1553_vm1 = vmmov 0   ;;  %1028 = vmatpush3.msk.msra.mxu1 %vm157_vm0, %v171_v10  ;;  %v468_v14 = vcombine.high %v464_v12, %v464_v12  ;;  %v472_v15 = vsel %vm157_vm0, %v464_v12, 0.0  ;;  %v469_v16 = vcombine.high %v465_v13, %v465_v13  ;;  %v269_v30 = vld [vmem:[#allocation7] sm:$0xff]  ;;  %v270_v31 = vld [vmem:[#allocation7 + $0x8] sm:$0xff]  ;;  %v271_v36 = vld [vmem:[#allocation7 + $0x10] sm:$0xff] }
  0x89   :  { %v159_v5 = vsel %vm157_vm0, %v153_v2, 0.0  ;;  %v164_v7 = vsel %vm157_vm0, %v154_v4, 0.0  ;;  %1029 = vmatprep.mubr.msk.f32.mxu1 %vm1553_vm1, %v1552_v11  ;;  %1099 = vmatprep.mubr.msk.f32.mxu0 %vm1553_vm1, %v1552_v11  ;;  %v1554_v17 = vmov 0.0|0.0   ;;  %v477_v19 = vsel %vm157_vm0, %v465_v13, 0.0  ;;  %v272_v37 = vld [vmem:[#allocation7 + $0x18] sm:$0xff]  ;;  %v273_v40 = vld [vmem:[#allocation7 + $0x20] sm:$0xff] }
  0x8a   :  { %v160_v8 = vadd.f32 %v159_v5, %v158_v3  ;;  %v165_v9 = vadd.f32 %v164_v7, %v163_v6  ;;  %1177 = vmatprep.subr.bf16.mxu1 %v1554_v17  ;;  %1201 = vmatprep.subr.bf16.mxu0 %v1554_v17  ;;  %v473_v18 = vsel %vm157_vm0, %v468_v14, 0.0  ;;  %v478_v20 = vsel %vm157_vm0, %v469_v16, 0.0  ;;  %v274_v41 = vld [vmem:[#allocation7 + $0x28] sm:$0xff]  ;;  %v275_v43 = vld [vmem:[#allocation7 + $0x30] sm:$0xff]  ;;  %v276_v44 = vld [vmem:[#allocation7 + $0x38] sm:$0xff] }
  0x8b   :  { %v474_v21 = vadd.f32 %v473_v18, %v472_v15  ;;  %v479_v22 = vadd.f32 %v478_v20, %v477_v19  ;;  %v182_v24 = vand.u32 127, %v181_v23  ;;  %v1786_v25 = vshrl.u32 %v181_v23, 7  ;;  %v277_v46 = vld [vmem:[#allocation7 + $0x40] sm:$0xff]  ;;  %v278_v47 = vld [vmem:[#allocation7 + $0x48] sm:$0xff]  ;;  %v279_v49 = vld [vmem:[#allocation7 + $0x50] sm:$0xff] }
  0x8c   :  { %161 = vadd.xlane.f32.xlu0 %v160_v8  ;;  %vm191_vm2 = vcmask 1041409   ;;  %vm193_vm3 = vcmask 31744   ;;  %v1178_v35 = vpack.c.bf16 %v270_v31, %v269_v30  ;;  %v1181_v39 = vpack.c.bf16 %v272_v37, %v271_v36  ;;  %v280_v50 = vld [vmem:[#allocation7 + $0x58] sm:$0xff]  ;;  %v281_v52 = vld [vmem:[#allocation7 + $0x60] sm:$0xff]  ;;  %v282_v53 = vld [vmem:[#allocation7 + $0x68] sm:$0xff] }
  0x8d   :  { %475 = vadd.xlane.f32.xlu1 %v474_v21  ;;  %v1789_v27 = vsub.s32 %v182_v24, %v1786_v25  ;;  %v1184_v42 = vpack.c.bf16 %v274_v41, %v273_v40  ;;  %v1187_v45 = vpack.c.bf16 %v276_v44, %v275_v43  ;;  %v1190_v48 = vpack.c.bf16 %v278_v47, %v277_v46  ;;  %v283_v55 = vld [vmem:[#allocation7 + $0x70] sm:$0xff]  ;;  %v284_v56 = vld [vmem:[#allocation7 + $0x78] sm:$0xff]  ;;  %v363_v58 = vld [vmem:[#allocation8] sm:$0xff] }
  0x8e   :  { %v1193_v51 = vpack.c.bf16 %v280_v50, %v279_v49  ;;  %v1196_v54 = vpack.c.bf16 %v282_v53, %v281_v52  ;;  %v1199_v57 = vpack.c.bf16 %v284_v56, %v283_v55  ;;  %v364_v59 = vld [vmem:[#allocation8 + $0x8] sm:$0xff]  ;;  %v365_v60 = vld [vmem:[#allocation8 + $0x10] sm:$0xff]  ;;  %v366_v62 = vld [vmem:[#allocation8 + $0x18] sm:$0xff]  ;;  %vm457_vm4 = vcmask 1041408  }
  0x8f   :  { %v1202_v61 = vpack.c.bf16 %v364_v59, %v363_v58  ;;  %v1205_v63 = vpack.c.bf16 %v366_v62, %v365_v60  ;;  %v367_v0 = vld [vmem:[#allocation8 + $0x20] sm:$0xff]  ;;  %v368_v1 = vld [vmem:[#allocation8 + $0x28] sm:$0xff]  ;;  %v369_v3 = vld [vmem:[#allocation8 + $0x30] sm:$0xff] }
  0x90   :  { %166 = vadd.xlane.f32.xlu0 %v165_v9  ;;  %v1208_v2 = vpack.c.bf16 %v368_v1, %v367_v0  ;;  %v370_v4 = vld [vmem:[#allocation8 + $0x38] sm:$0xff]  ;;  %v371_v6 = vld [vmem:[#allocation8 + $0x40] sm:$0xff]  ;;  %v372_v7 = vld [vmem:[#allocation8 + $0x48] sm:$0xff] }
  0x91   :  { %480 = vadd.xlane.f32.xlu1 %v479_v22  ;;  %1203 = vmatpush3.bf16.msra.mxu0 %v1202_v61  ;;  %v1211_v5 = vpack.c.bf16 %v370_v4, %v369_v3  ;;  %v1214_v8 = vpack.c.bf16 %v372_v7, %v371_v6  ;;  %v373_v9 = vld [vmem:[#allocation8 + $0x50] sm:$0xff]  ;;  %v374_v10 = vld [vmem:[#allocation8 + $0x58] sm:$0xff]  ;;  %v375_v13 = vld [vmem:[#allocation8 + $0x60] sm:$0xff] }
  0x92   :  { %1204 = vmatprep.subr.bf16.mxu0 %v1554_v17  ;;  %v1217_v12 = vpack.c.bf16 %v374_v10, %v373_v9  ;;  %v376_v14 = vld [vmem:[#allocation8 + $0x68] sm:$0xff]  ;;  %v945_v21 = vld [vmem:[%s1892_s3] ss:$0 sm:$0xff]  ;;  %v378_v31 = vld [vmem:[#allocation8 + $0x78] sm:$0xff] }
  0x93   :  { %v1220_v15 = vpack.c.bf16 %v376_v14, %v375_v13  ;;  %v580_v41 = vld [vmem:[#allocation10 + $0x10] sm:$0xff]  ;;  %v582_v46 = vld [vmem:[#allocation10 + $0x20] sm:$0xff]  ;;  %v583_v47 = vld [vmem:[#allocation10 + $0x28] sm:$0xff] }
  0x94   :  { %v584_v49 = vld [vmem:[#allocation10 + $0x30] sm:$0xff]  ;;  %v585_v50 = vld [vmem:[#allocation10 + $0x38] sm:$0xff]  ;;  %v586_v52 = vld [vmem:[#allocation10 + $0x40] sm:$0xff] }
  0x95   :  { %1206 = vmatpush3.bf16.msra.mxu0 %v1205_v63  ;;  %v587_v53 = vld [vmem:[#allocation10 + $0x48] sm:$0xff]  ;;  %v588_v55 = vld [vmem:[#allocation10 + $0x50] sm:$0xff]  ;;  %v589_v56 = vld [vmem:[#allocation10 + $0x58] sm:$0xff] }
  0x96   :  { %1207 = vmatprep.subr.bf16.mxu0 %v1554_v17  ;;  %v590_v58 = vld [vmem:[#allocation10 + $0x60] sm:$0xff]  ;;  %v591_v59 = vld [vmem:[#allocation10 + $0x68] sm:$0xff]  ;;  %v592_v61 = vld [vmem:[#allocation10 + $0x70] sm:$0xff] }
  0x97   :  { %v1244_v60 = vpack.c.bf16 %v591_v59, %v590_v58  ;;  %v593_v62 = vld [vmem:[#allocation10 + $0x78] sm:$0xff]  ;;  %v950_v0 = vld [vmem:[%s1898_s9] ss:$0 sm:$0xff]  ;;  %v673_v3 = vld [vmem:[#allocation11 + $0x8] sm:$0xff] }
  0x98   :  { %v1247_v63 = vpack.c.bf16 %v593_v62, %v592_v61  ;;  %v675_v6 = vld [vmem:[#allocation11 + $0x18] sm:$0xff]  ;;  %v676_v7 = vld [vmem:[#allocation11 + $0x20] sm:$0xff]  ;;  %v677_v9 = vld [vmem:[#allocation11 + $0x28] sm:$0xff] }
  0x99   :  { %1209 = vmatpush3.bf16.msra.mxu0 %v1208_v2  ;;  %v672_v2 = vld [vmem:[#allocation11] sm:$0xff]  ;;  %v1256_v10 = vpack.c.bf16 %v677_v9, %v676_v7  ;;  %v679_v13 = vld [vmem:[#allocation11 + $0x38] sm:$0xff]  ;;  %v796_v61 = vld [vmem:[#allocation13 + $0x90] sm:$0xff] }
  0x9a   :  { %1210 = vmatprep.subr.bf16.mxu0 %v1554_v17  ;;  %v1250_v4 = vpack.c.bf16 %v673_v3, %v672_v2  ;;  %v797_v58 = vld [vmem:[#allocation13 + $0x98] sm:$0xff]  ;;  %v800_v3 = vld [vmem:[#allocation13 + $0xb0] sm:$0xff] }
  0x9b   :  { %v804_v9 = vld [vmem:[#allocation13 + $0xd0] sm:$0xff] }
  0x9d   :  { %1212 = vmatpush3.bf16.msra.mxu0 %v1211_v5  ;;  %v674_v5 = vld [vmem:[#allocation11 + $0x10] sm:$0xff] }
  0x9e   :  { %1213 = vmatprep.subr.bf16.mxu0 %v1554_v17 }
  0xa1   :  { %1215 = vmatpush3.bf16.msra.mxu0 %v1214_v8  ;;  %v1253_v8 = vpack.c.bf16 %v675_v6, %v674_v5  ;;  %v805_v5 = vld [vmem:[#allocation13 + $0xd8] sm:$0xff] }
  0xa2   :  { %1216 = vmatprep.subr.bf16.mxu0 %v1554_v17 }
  0xa5   :  { %1218 = vmatpush3.bf16.msra.mxu0 %v1217_v12  ;;  %v678_v12 = vld [vmem:[#allocation11 + $0x30] sm:$0xff] }
  0xa6   :  { %1219 = vmatprep.subr.bf16.mxu0 %v1554_v17  ;;  %v1259_v14 = vpack.c.bf16 %v679_v13, %v678_v12  ;;  %v809_v12 = vld [vmem:[#allocation13 + $0xf8] sm:$0xff] }
  0xa9   :  { %1221 = vmatpush3.bf16.msra.mxu0 %v1220_v15  ;;  %v681_v15 = vld [vmem:[#allocation11 + $0x48] sm:$0xff] }
  0xaa   :  { %1222 = vmatprep.subr.bf16.mxu0 %v1554_v17 }
 0x119   :  { %v162_v26 = vpop.xlane.xlu0 %161 }
 0x11a   :  { %v169_v28 = vmul.f32 0.00390625, %v162_v26  ;;  %v476_v16 = vpop.xlane.xlu1 %475 }
 0x11b   :  { %v482_v19 = vmul.f32 0.00390625, %v476_v16 }
 0x11c   :  { %v186_v33 = vrot.slane %v169_v28, %v1789_v27 }
 0x11d   :  { %v167_v29 = vpop.xlane.xlu0 %166  ;;  %v497_v23 = vrot.slane %v482_v19, %v1789_v27  ;;  %v683_v19 = vld [vmem:[#allocation11 + $0x58] sm:$0xff] }
 0x11e   :  { %v170_v32 = vmul.f32 0.00390625, %v167_v29  ;;  %v481_v18 = vpop.xlane.xlu1 %480  ;;  %v484_v29 = vld [vmem:[%s1897_s8] sm:$0xf] }
 0x11f   :  { %v483_v20 = vmul.f32 0.00390625, %v481_v18  ;;  %v682_v18 = vld [vmem:[#allocation11 + $0x50] sm:$0xff] }
 0x120   :  { %v190_v34 = vrot.slane %v170_v32, %v1789_v27 }
 0x121   :  { %v501_v24 = vrot.slane %v483_v20, %v1789_v27  ;;  %v377_v27 = vld [vmem:[#allocation8 + $0x70] sm:$0xff]  ;;  %v1265_v20 = vpack.c.bf16 %v683_v19, %v682_v18 }
 0x122   :  { %v192_v38 = vsel %vm191_vm2, %v190_v34, %v186_v33  ;;  %v1223_v32 = vpack.c.bf16 %v378_v31, %v377_v27  ;;  %v948_v33 = vld [vmem:[%s1894_s5] ss:$0 sm:$0xff] }
 0x123   :  { %1030 = vmatmul.mubr.msk.f32.vlgmr.msra.gmra.mrb[0].mxu1 %vm193_vm3, %v192_v38  ;;  %v502_v30 = vsel %vm191_vm2, %v501_v24, %v497_v23  ;;  %v578_v34 = vld [vmem:[#allocation10] sm:$0xff]  ;;  %v686_v24 = vld [vmem:[#allocation11 + $0x70] sm:$0xff] }
 0x124   :  { %1179 = vmatpush3.bf16.msra.mxu1 %v1178_v35  ;;  %1064 = vmatprep.mubr.msk.f32.mxu1 %vm1553_vm1, %v1552_v11  ;;  %v579_v35 = vld [vmem:[#allocation10 + $0x8] sm:$0xff]  ;;  %v778_v27 = vld [vmem:[#allocation13] sm:$0xff] }
 0x125   :  { %1180 = vmatprep.subr.bf16.mxu1 %v1554_v17  ;;  %1224 = vmatpush3.bf16.msra.mxu0 %v1223_v32  ;;  %v780_v32 = vld [vmem:[#allocation13 + $0x10] sm:$0xff] }
 0x126   :  { %1225 = vmatprep.subr.bf16.mxu0 %v1554_v17 }
 0x128   :  { %1182 = vmatpush3.bf16.msra.mxu1 %v1181_v39  ;;  %v1226_v39 = vpack.c.bf16 %v579_v35, %v578_v34  ;;  %v785_v34 = vld [vmem:[#allocation13 + $0x38] sm:$0xff]  ;;  %v1275_v35 = vpack.c.bf16 %v780_v32, %v778_v27 }
 0x129   :  { %1183 = vmatprep.subr.bf16.mxu1 %v1554_v17 }
 0x12c   :  { %1185 = vmatpush3.bf16.msra.mxu1 %v1184_v42  ;;  %v581_v42 = vld [vmem:[#allocation10 + $0x18] sm:$0xff] }
 0x12d   :  { %1186 = vmatprep.subr.bf16.mxu1 %v1554_v17 }
 0x130   :  { %1188 = vmatpush3.bf16.msra.mxu1 %v1187_v45  ;;  %v1229_v45 = vpack.c.bf16 %v581_v42, %v580_v41  ;;  %v786_v42 = vld [vmem:[#allocation13 + $0x40] sm:$0xff] }
 0x131   :  { %1189 = vmatprep.subr.bf16.mxu1 %v1554_v17 }
 0x134   :  { %1191 = vmatpush3.bf16.msra.mxu1 %v1190_v48  ;;  %v1232_v48 = vpack.c.bf16 %v583_v47, %v582_v46 }
 0x135   :  { %1192 = vmatprep.subr.bf16.mxu1 %v1554_v17 }
 0x138   :  { %1194 = vmatpush3.bf16.msra.mxu1 %v1193_v51  ;;  %v1235_v51 = vpack.c.bf16 %v585_v50, %v584_v49  ;;  %v792_v49 = vld [vmem:[#allocation13 + $0x70] sm:$0xff] }
 0x139   :  { %1195 = vmatprep.subr.bf16.mxu1 %v1554_v17 }
 0x13c   :  { %1197 = vmatpush3.bf16.msra.mxu1 %v1196_v54  ;;  %v1238_v54 = vpack.c.bf16 %v587_v53, %v586_v52 }
 0x13d   :  { %1198 = vmatprep.subr.bf16.mxu1 %v1554_v17 }
 0x140   :  { %1200 = vmatpush3.bf16.msra.mxu1 %v1199_v57  ;;  %v1241_v57 = vpack.c.bf16 %v589_v56, %v588_v55 }
 0x141   :  { %1102 = vmatprep.subr.mxu1 %v1552_v11 }
 0x1f6   :  { %v265_v22 = vpop.f32.mrb[0].mxu1 }
 0x1f7   :  { %v266_v26 = vadd.f32 %v945_v21, %v265_v22  ;;  %v1031_v28 = vpop.f32.mrb[1].mxu1  ;;  %v684_v21 = vld [vmem:[#allocation11 + $0x60] sm:$0xff]  ;;  %v685_v22 = vld [vmem:[#allocation11 + $0x68] sm:$0xff] }
 0x1f8   :  { %v1268_v23 = vpack.c.bf16 %v685_v22, %v684_v21 }
 0x1f9   :  { %1065 = vmatmul.mubr.f32.vlgmr.msra.gmra.mrb[2].mxu1 %v266_v26  ;;  %v687_v26 = vld [vmem:[#allocation11 + $0x78] sm:$0xff] }
 0x1fa   :  { %1103 = vmatpush3.msk.msra.mxu1 %vm157_vm0, %v484_v29  ;;  %1104 = vmatprep.mubr.msk.f32.mxu1 %vm1553_vm1, %v1552_v11  ;;  %v1271_v28 = vpack.c.bf16 %v687_v26, %v686_v24  ;;  %v779_v29 = vld [vmem:[#allocation13 + $0x8] sm:$0xff] }
 0x1fb   :  { %1249 = vmatprep.subr.bf16.mxu1 %v1554_v17 }
 0x1fd   :  { %1105 = vmatmul.mubr.msk.f32.vlgmr.msra.gmra.mrb[4].mxu1 %vm193_vm3, %v502_v30  ;;  %v781_v30 = vld [vmem:[#allocation13 + $0x18] sm:$0xff] }
 0x1fe   :  { %1174 = vmatprep.mubr.msk.f32.mxu1 %vm1553_vm1, %v1552_v11  ;;  %1251 = vmatpush3.bf16.msra.mxu1 %v1250_v4  ;;  %v1273_v31 = vpack.c.bf16 %v781_v30, %v779_v29  ;;  %v803_v4 = vld [vmem:[#allocation13 + $0xc8] sm:$0xff]  ;;  %v954_v30 = vld [vmem:[%s1902_s13] ss:$0 sm:$0xff]  ;;  %s1556_s13 = smov [#allocation15]  }
 0x1ff   :  { %1252 = vmatprep.subr.bf16.mxu1 %v1554_v17  ;;  %v1297_v7 = vpack.c.bf16 %v805_v5, %v803_v4  ;;  %s929_s23 = sshll.u32 %s1556_s13, 4  ;;  %s930_s23 = int_to_ptr.vmem [resolvable:$true] %s929_s23 }
 0x200   :  { %s1485_s21 = scalar_lea.vmem %s930_s23, 32  ;;  %p1490_p1 = scmp.lt.s32.totalorder %s930_s23, %s930_s23 }
 0x201   :  { %p1486_p0 = scmp.ne.s32.totalorder %s930_s23, %s1485_s21  ;;  %p1491_p2 = scmp.lt.s32.totalorder %s1485_s21, %s1485_s21 }
 0x202   :  { %1254 = vmatpush3.bf16.msra.mxu1 %v1253_v8  ;;  %v802_v8 = vld [vmem:[#allocation13 + $0xc0] sm:$0xff] }
 0x203   :  { %1255 = vmatprep.subr.bf16.mxu1 %v1554_v17  ;;  %v1299_v13 = vpack.c.bf16 %v804_v9, %v802_v8  ;;  %p1492_p3 = por %p1491_p2, %p1490_p1 }
 0x205   :  { %p1493_p4 = pnand %p1492_p3, %p1486_p0 }
 0x206   :  { %1257 = vmatpush3.bf16.msra.mxu1 %v1256_v10  ;;  %v807_v10 = vld [vmem:[#allocation13 + $0xe8] sm:$0xff] }
 0x207   :  { %1258 = vmatprep.subr.bf16.mxu1 %v1554_v17 }
 0x20a   :  { %1260 = vmatpush3.bf16.msra.mxu1 %v1259_v14  ;;  %v1301_v14 = vpack.c.bf16 %v809_v12, %v807_v10 }
 0x20b   :  { %1261 = vmatprep.subr.bf16.mxu1 %v1554_v17 }
 0x2cc   :  { %v358_v36 = vpop.f32.mrb[2].mxu1 }
 0x2cd   :  { %v359_v37 = vadd.f32 %v948_v33, %v358_v36  ;;  %v1066_v38 = vpop.f32.mrb[3].mxu1  ;;  %v783_v33 = vld [vmem:[#allocation13 + $0x28] sm:$0xff] }
 0x2ce   :  { %v1277_v36 = vpack.c.bf16 %v785_v34, %v783_v33  ;;  %v784_v38 = vld [vmem:[#allocation13 + $0x30] sm:$0xff] }
 0x2cf   :  { %v362_v40 = vmax.f32 %v359_v37, 0.0  ;;  %v782_v37 = vld [vmem:[#allocation13 + $0x20] sm:$0xff] }
 0x2d0   :  { %v574_v43 = vpop.f32.mrb[4].mxu1 }
 0x2d1   :  { %1100 = vmatmul.mubr.f32.vlgmr.msra.gmra.mrb[0].mxu0 %v362_v40  ;;  %v1106_v44 = vpop.f32.mrb[5].mxu1  ;;  %v575_v1 = vadd.f32 %v950_v0, %v574_v43  ;;  %v789_v40 = vld [vmem:[#allocation13 + $0x58] sm:$0xff]  ;;  %v788_v43 = vld [vmem:[#allocation13 + $0x50] sm:$0xff] }
 0x2d2   :  { %1227 = vmatpush3.bf16.msra.mxu0 %v1226_v39  ;;  %1139 = vmatprep.mubr.msk.f32.mxu0 %vm1553_vm1, %v1552_v11  ;;  %v787_v39 = vld [vmem:[#allocation13 + $0x48] sm:$0xff]  ;;  %v1283_v46 = vpack.c.bf16 %v788_v43, %v786_v42  ;;  %v801_v0 = vld [vmem:[#allocation13 + $0xb8] sm:$0xff] }
 0x2d3   :  { %1228 = vmatprep.subr.bf16.mxu0 %v1554_v17  ;;  %v1281_v41 = vpack.c.bf16 %v789_v40, %v787_v39  ;;  %v791_v44 = vld [vmem:[#allocation13 + $0x68] sm:$0xff] }
 0x2d6   :  { %1230 = vmatpush3.bf16.msra.mxu0 %v1229_v45  ;;  %v793_v45 = vld [vmem:[#allocation13 + $0x78] sm:$0xff] }
 0x2d7   :  { %1231 = vmatprep.subr.bf16.mxu0 %v1554_v17  ;;  %v1285_v47 = vpack.c.bf16 %v793_v45, %v791_v44 }
 0x2da   :  { %1233 = vmatpush3.bf16.msra.mxu0 %v1232_v48  ;;  %v790_v48 = vld [vmem:[#allocation13 + $0x60] sm:$0xff] }
 0x2db   :  { %1234 = vmatprep.subr.bf16.mxu0 %v1554_v17  ;;  %v1287_v50 = vpack.c.bf16 %v792_v49, %v790_v48 }
 0x2de   :  { %1236 = vmatpush3.bf16.msra.mxu0 %v1235_v51  ;;  %v949_v51 = vld [vmem:[%s1896_s7] ss:$0 sm:$0xff] }
 0x2df   :  { %1237 = vmatprep.subr.bf16.mxu0 %v1554_v17 }
 0x2e2   :  { %1239 = vmatpush3.bf16.msra.mxu0 %v1238_v54 }
 0x2e3   :  { %1240 = vmatprep.subr.bf16.mxu0 %v1554_v17 }
 0x2e6   :  { %1242 = vmatpush3.bf16.msra.mxu0 %v1241_v57  ;;  %v795_v57 = vld [vmem:[#allocation13 + $0x88] sm:$0xff] }
 0x2e7   :  { %1243 = vmatprep.subr.bf16.mxu0 %v1554_v17  ;;  %v1289_v59 = vpack.c.bf16 %v797_v58, %v795_v57 }
 0x2ea   :  { %1245 = vmatpush3.bf16.msra.mxu0 %v1244_v60  ;;  %v794_v60 = vld [vmem:[#allocation13 + $0x80] sm:$0xff] }
 0x2eb   :  { %1246 = vmatprep.subr.bf16.mxu0 %v1554_v17  ;;  %v1291_v62 = vpack.c.bf16 %v796_v61, %v794_v60 }
 0x2ee   :  { %1248 = vmatpush3.bf16.msra.mxu0 %v1247_v63  ;;  %v799_v63 = vld [vmem:[#allocation13 + $0xa8] sm:$0xff] }
 0x2ef   :  { %1274 = vmatprep.subr.bf16.mxu0 %v1273_v31  ;;  %v1293_v2 = vpack.c.bf16 %v801_v0, %v799_v63 }
 0x2f1   :  { %1140 = vmatmul.mubr.f32.vlgmr.msra.gmra.mrb[2].mxu0 %v575_v1  ;;  %v798_v1 = vld [vmem:[#allocation13 + $0xa0] sm:$0xff] }
 0x2f2   :  { %874 = vmatprep.mubr.f32.mxu0 %v1552_v11  ;;  %v680_v11 = vld [vmem:[#allocation11 + $0x40] sm:$0xff]  ;;  %1276 = vmatpush1.bf16.msra.mxu0 %v1275_v35  ;;  %v1295_v6 = vpack.c.bf16 %v800_v3, %v798_v1 }
 0x2f3   :  { %v1262_v16 = vpack.c.bf16 %v681_v15, %v680_v11  ;;  %1278 = vmatprep.subr.bf16.mxu0 %v1277_v36  ;;  %v806_v11 = vld [vmem:[#allocation13 + $0xe0] sm:$0xff]  ;;  %v808_v15 = vld [vmem:[#allocation13 + $0xf0] sm:$0xff] }
 0x2f4   :  { %v1303_v18 = vpack.c.bf16 %v808_v15, %v806_v11 }
 0x2f5   :  { %1263 = vmatpush3.bf16.msra.mxu1 %v1262_v16  ;;  %v953_v16 = vld [vmem:[%s1900_s11] ss:$0 sm:$0xff]  ;;  %s1555_s11 = smov 1  }
 0x2f6   :  { %1264 = vmatprep.subr.bf16.mxu1 %v1554_v17 }
 0x2f9   :  { %1266 = vmatpush3.bf16.msra.mxu1 %v1265_v20 }
 0x2fa   :  { %1267 = vmatprep.subr.bf16.mxu1 %v1554_v17 }
 0x2fd   :  { %1269 = vmatpush3.bf16.msra.mxu1 %v1268_v23 }
 0x2fe   :  { %1270 = vmatprep.subr.bf16.mxu1 %v1554_v17  ;;  %v1279_v17 = vpack.c.bf16 %v784_v38, %v782_v37 }
 0x300   :  { %1280 = vmatpush1.bf16.msra.mxu0 %v1279_v17 }
 0x301   :  { %1272 = vmatpush3.bf16.msra.mxu1 %v1271_v28  ;;  %1282 = vmatprep.subr.bf16.mxu0 %v1281_v41 }
 0x304   :  { %1284 = vmatpush1.bf16.msra.mxu0 %v1283_v46 }
 0x305   :  { %1286 = vmatprep.subr.bf16.mxu0 %v1285_v47 }
 0x308   :  { %1288 = vmatpush1.bf16.msra.mxu0 %v1287_v50 }
 0x309   :  { %1290 = vmatprep.subr.bf16.mxu0 %v1289_v59 }
 0x30c   :  { %1292 = vmatpush1.bf16.msra.mxu0 %v1291_v62 }
 0x30d   :  { %1294 = vmatprep.subr.bf16.mxu0 %v1293_v2 }
 0x310   :  { %1296 = vmatpush1.bf16.msra.mxu0 %v1295_v6 }
 0x311   :  { %1298 = vmatprep.subr.bf16.mxu0 %v1297_v7 }
 0x314   :  { %1300 = vmatpush1.bf16.msra.mxu0 %v1299_v13 }
 0x315   :  { %1302 = vmatprep.subr.bf16.mxu0 %v1301_v14 }
 0x318   :  { %1304 = vmatpush1.bf16.msra.mxu0 %v1303_v18 }
 0x3a4   :  { %v452_v52 = vpop.f32.mrb[0].mxu0 }
 0x3a5   :  { %v453_v53 = vadd.f32 %v949_v51, %v452_v52  ;;  %v1101_v54 = vpop.f32.mrb[1].mxu0 }
 0x3a7   :  { %v456_v55 = vmul.f32 %v453_v53, %v453_v53 }
 0x3a9   :  { %v458_v56 = vsel %vm457_vm4, %v456_v55, 0.0 }
 0x3aa   :  { %459 = vadd.xlane.f32.xlu0 %v458_v56 }
 0x3c4   :  { %v667_v19 = vpop.f32.mrb[2].mxu0 }
 0x3c5   :  { %v668_v20 = vadd.f32 %v953_v16, %v667_v19  ;;  %v1141_v21 = vpop.f32.mrb[3].mxu0 }
 0x3c7   :  { %v671_v22 = vmax.f32 %v668_v20, 0.0 }
 0x3c9   :  { %1175 = vmatmul.mubr.f32.vlgmr.msra.gmra.mrb[6].mxu1 %v671_v22 }
 0x437   :  { %v460_v23 = vpop.xlane.xlu0 %459 }
 0x438   :  { %v461_v24 = vmax.f32 %v460_v23, 1e-24 }
 0x43a   :  { %1327 = vrsqrt.f32 %v461_v24 }
 0x444   :  { %v1328_v26 = vpop.eup %1327 }
 0x445   :  { %v463_v28 = vmul.f32 %v1328_v26, %v453_v53 }
 0x447   :  { %v773_v29 = vmul.f32 14.285714, %v463_v28 }
 0x449   :  { %875 = vmatmul.mubr.f32.vlgmr.msra.gmra.mrb[4].mxu0 %v773_v29 }
 0x49c   :  { %v761_v27 = vpop.f32.mrb[6].mxu1 }
 0x49d   :  { %v762_v31 = vadd.f32 %v954_v30, %v761_v27  ;;  %v1176_v32 = vpop.f32.mrb[7].mxu1 }
 0x49f   :  { %v765_v33 = vmul.f32 %v762_v31, %v762_v31 }
 0x4a1   :  { %v766_v34 = vsel %vm457_vm4, %v765_v33, 0.0 }
 0x4a2   :  { %767 = vadd.xlane.f32.xlu1 %v766_v34 }
 0x51c   :  { %v876_v35 = vpop.f32.mrb[4].mxu0 }
 0x51d   :  { %v878_v36 = vpop.f32.mrb[5].mxu0  ;;  %883 = vrot.lane.b32.xlu1 %v876_v35, %s1555_s11 }
 0x52f   :  { %v768_v37 = vpop.xlane.xlu1 %767 }
 0x530   :  { %v769_v38 = vmax.f32 %v768_v37, 1e-24 }
 0x532   :  { %1329 = vrsqrt.f32 %v769_v38 }
 0x53c   :  { %v1330_v39 = vpop.eup %1329 }
 0x53d   :  { %v771_v40 = vmul.f32 %v1330_v39, %v762_v31 }
 0x53f   :  { %v774_v17 = vmul.f32 %v773_v29, %v771_v40  ;;  %772 = vst [vmem:[#allocation15] sm:$0x3] %v771_v40 }
 0x541   :  { %v775_v41 = vsel %vm457_vm4, %v774_v17, 0.0 }
 0x542   :  { %776 = vadd.xlane.f32.xlu0 %v775_v41 }
 0x558   :  { %885 = vrot.lane.b32.xlu0 %v878_v36, %s1555_s11 }
 0x559   :  { %1496 = shalt.err (!%p1493_p4)
}
 0x55a   :  { %s1497_s20 = scalar_lea.hbm %s1905_s16, 32 }
 0x55b   :  { %p1498_p5 = scmp.ne.s32.totalorder %s1905_s16, %s1497_s20  ;;  %p1501_p6 = scmp.lt.u32.totalorder %s1497_s20, %s1905_s16 }
 0x55d   :  { %p1503_p7 = pnand %p1501_p6, %p1498_p5 }
 0x55f   :  { %1506 = shalt.err (!%p1503_p7)
}
 0x560   :  { %932 = dma.vmem_to_hbm [thread:$0]  %s930_s23, 32, %s1905_s16, [#allocation16]   ;;  %v1557_v42 = vmov 1983009808   ;;  %vm887_vm5 = vcmask 7168  }
 0x561   :  { %v897_v43 = vunpack.c.l.s4 %v1557_v42  ;;  %s1558_s14 = smov [#allocation14]  }
 0x562   :  { %s919_s22 = sshll.u32 %s1558_s14, 4  ;;  %s920_s22 = int_to_ptr.vmem [resolvable:$true] %s919_s22 }
 0x563   :  { %v898_v45 = vunpack.c.0.s8 %v897_v43  ;;  %s1507_s16 = scalar_lea.vmem %s920_s22, 96  ;;  %p1512_p9 = scmp.lt.s32.totalorder %s920_s22, %s920_s22 }
 0x564   :  { %p1508_p8 = scmp.ne.s32.totalorder %s920_s22, %s1507_s16  ;;  %p1513_p10 = scmp.lt.s32.totalorder %s1507_s16, %s1507_s16 }
 0x565   :  { %v901_v47 = vsub.s32 %v898_v45, %v1786_v25 }
 0x566   :  { %p1514_p11 = por %p1513_p10, %p1512_p9 }
 0x568   :  { %p1515_p12 = pnand %p1514_p11, %p1508_p8 }
 0x58f   :  { %v884_v46 = vpop.permute.xlu1 %883 }
 0x5cf   :  { %v777_v44 = vpop.xlane.xlu0 %776 }
 0x5d0   :  { %v891_v49 = vsel %vm887_vm5, %v777_v44, %v884_v46 }
 0x5d3   :  { %v886_v48 = vpop.permute.xlu0 %885 }
 0x5d4   :  { %v888_v50 = vsel %vm887_vm5, %v884_v46, %v886_v48  ;;  %v892_v51 = vsel %vm887_vm5, %v886_v48, 0.0 }
 0x5d5   :  { %v895_v52 = vcombine.low %v891_v49, %v888_v50  ;;  %v909_v54 = vrot.slane %v892_v51, %v901_v47 }
 0x5d7   :  { %v902_v53 = vrot.slane %v895_v52, %v901_v47 }
 0x5d9   :  { %v910_v55 = vcombine.low %v902_v53, %v909_v54 }
 0x5db   :  { %912 = vst [vmem:[#allocation14] sm:$0x3f] %v910_v55 }
 0x5dc   :  { %1518 = shalt.err (!%p1515_p12)
}
 0x5dd   :  { %s1519_s25 = scalar_lea.hbm %s1904_s15, 96 }
 0x5de   :  { %p1520_p13 = scmp.ne.s32.totalorder %s1904_s15, %s1519_s25  ;;  %p1523_p0 = scmp.lt.u32.totalorder %s1519_s25, %s1904_s15 }
 0x5e0   :  { %p1525_p1 = pnand %p1523_p0, %p1520_p13 }
 0x5e2   :  { %1528 = shalt.err (!%p1525_p1)
}
 0x5e3   :  { %922 = dma.vmem_to_hbm [thread:$0]  %s920_s22, 96, %s1904_s15, [#allocation4]  }
 0x5e4   :  { %1537 = dma.done.wait [#allocation4], 96  }
 0x5e5   :  { %1538 = vsyncadd [#allocation4], 4294967200 }
 0x5e6   :  { %1539 = dma.done.wait [#allocation16], 32  }
 0x5e7   :  { %1540 = vsyncadd [#allocation16], 4294967264 }
 0x5e8   :  { %939 = vsyncpa [#allocation3], 1 }
 0x5e9   :  { %940 = vsyncpa [#allocation6], 1 }
 0x5ea   :  { %941 = vsyncpa [#allocation9], 1 }
 0x5eb   :  { %942 = vsyncpa [#allocation12], 1 }
 0x5ec   :  { %943 = vsyncpa [#allocation4], 1 }
 0x5ed   :  { %944 = vsyncpa [#allocation16], 1 }

</bundles_post_ra>
